<compile_context>
chip_gen: v7x
topology: tpu7x:2x2x1
jax: 0.10.0
libtpu: 0.0.40
codegen_flags: <defaults>
</compile_context>

<pallas_src>
import functools
import math

import jax
import jax.numpy as jnp
from jax.experimental import pallas as pl
from jax.experimental.pallas import tpu as pltpu

_LANES = 128
_SUBLANES = 8
_ACC_ROWS = 64                      # accumulator rows per split -> 8 independent vreg chains
_TILE_BYTES = 2 * 1024 * 1024       # per-input, per-pipeline-buffer tile byte budget
_VMEM_LIMIT = 32 * 1024 * 1024      # explicit scoped-VMEM limit (safe on v5e/v6e/v7x)


def _cdiv(a: int, b: int) -> int:
    return -(-a // b)


def _num_tensorcores() -> int:
    """Best-effort TensorCore-per-chip count: 2 on v7x, 1 on v5e/v6e."""
    try:
        kind = jax.devices()[0].device_kind.lower()
    except Exception:
        return 1
    return 2 if ("v7" in kind or "tpu7" in kind) else 1


def _kl_sum_kernel(mu_ref, lv_ref, o_ref, *, tile_rows, rows_valid, need_mask,
                   two_core):
    """Accumulate sum of (1 + logvar - mu^2 - exp(logvar)) into a resident
    (64, 128) f32 block per split; the -0.5 scale is applied in the wrapper."""
    if two_core:
        j = pl.program_id(1)                                   # reduction axis
        tile_idx = pl.program_id(0) * pl.num_programs(1) + j   # global row-tile index
    else:
        j = pl.program_id(0)
        tile_idx = j

    @pl.when(j == 0)
    def _init():
        o_ref[...] = jnp.zeros_like(o_ref)

    mu = mu_ref[...].astype(jnp.float32)
    lv = lv_ref[...].astype(jnp.float32)
    # Zero-padded tail elements (mu = logvar = 0) contribute 1 + 0 - 0 - exp(0) = 0.
    term = (1.0 + lv) - mu * mu - jnp.exp(lv)

    def _accumulate(t):
        if tile_rows % _ACC_ROWS == 0:
            # 8 independent (8,128)-vreg add chains -> fills the VALU slots.
            o_ref[...] += t.reshape(tile_rows // _ACC_ROWS, _ACC_ROWS, _LANES).sum(axis=0)
        elif tile_rows % _SUBLANES == 0:
            o_ref[0:_SUBLANES, :] += t.reshape(
                tile_rows // _SUBLANES, _SUBLANES, _LANES).sum(axis=0)
        else:
            # Tiny single-tile case (block == full array).
            o_ref[0:1, :] += jnp.sum(t, axis=0, keepdims=True)

    if need_mask:
        # Only the single true tail tile pays for the mask; every other tile
        # takes the plain-accumulate branch.
        row0 = tile_idx * tile_rows
        is_tail = row0 + tile_rows > rows_valid

        @pl.when(is_tail)
        def _tail():
            rows = row0 + jax.lax.broadcasted_iota(jnp.int32, (tile_rows, _LANES), 0)
            _accumulate(jnp.where(rows < rows_valid, term, 0.0))

        @pl.when(jnp.logical_not(is_tail))
        def _body():
            _accumulate(term)
    else:
        _accumulate(term)


def _kl_sum(mu_2d: jax.Array, lv_2d: jax.Array) -> jax.Array:
    """Pallas call: inputs are (R, 128) in native dtype; returns scalar f32 sum
    of (1 + logvar - mu^2 - exp(logvar))."""
    R, L = mu_2d.shape
    assert L == _LANES and mu_2d.shape == lv_2d.shape

    itemsize = jnp.dtype(mu_2d.dtype).itemsize
    max_rows = max(_ACC_ROWS,
                   ((_TILE_BYTES // (_LANES * itemsize)) // _ACC_ROWS) * _ACC_ROWS)

    def _run(tile_rows, grid, in_map, out_map, dims, n_out_blocks, need_mask, two_core):
        kernel = functools.partial(
            _kl_sum_kernel,
            tile_rows=tile_rows,
            rows_valid=R,
            need_mask=need_mask,
            two_core=two_core,
        )
        out = pl.pallas_call(
            kernel,
            out_shape=jax.ShapeDtypeStruct((n_out_blocks * _ACC_ROWS, _LANES), jnp.float32),
            grid_spec=pltpu.PrefetchScalarGridSpec(
                num_scalar_prefetch=0,
                grid=grid,
                in_specs=[
                    pl.BlockSpec((tile_rows, _LANES), in_map),
                    pl.BlockSpec((tile_rows, _LANES), in_map),
                ],
                out_specs=pl.BlockSpec((_ACC_ROWS, _LANES), out_map),
            ),
            compiler_params=pltpu.CompilerParams(
                dimension_semantics=dims,
                vmem_limit_bytes=_VMEM_LIMIT,
            ),
        )(mu_2d, lv_2d)
        # Tiny (n_out_blocks*64, 128) final reduce in XLA.
        return jnp.sum(out)

    # ---- v7x: shard row tiles across the two TensorCores (CORE_PARALLEL) ----
    if _num_tensorcores() >= 2 and R > _ACC_ROWS:
        inner = _cdiv(_cdiv(R, 2), max_rows)
        tile_rows = _ACC_ROWS * _cdiv(R, 2 * inner * _ACC_ROWS)
        # Even, non-overlapping split: 2*inner distinct tiles cover all R rows,
        # no clamped/duplicated tile reads.  Guard: every block index in-bounds.
        if (2 * inner - 1) * tile_rows < R:
            core_parallel = getattr(pltpu, "CORE_PARALLEL", "parallel")
            try:
                return _run(
                    tile_rows=tile_rows,
                    grid=(2, inner),
                    in_map=lambda s, j: (s * inner + j, 0),
                    out_map=lambda s, j: (s, 0),
                    dims=(core_parallel, "arbitrary"),
                    n_out_blocks=2,
                    need_mask=(2 * inner * tile_rows) != R,
                    two_core=True,
                )
            except Exception:
                pass  # defensive: fall back to the single-core grid below

    # ---- single TensorCore (v5e / v6e): plain 1-D reduction grid -------------
    tile_rows = R if R <= max_rows else max_rows
    total_tiles = _cdiv(R, tile_rows)
    return _run(
        tile_rows=tile_rows,
        grid=(total_tiles,),
        in_map=lambda j: (j, 0),
        out_map=lambda j: (0, 0),
        dims=("arbitrary",),
        n_out_blocks=1,
        need_mask=(total_tiles * tile_rows) != R,
        two_core=False,
    )


def kl_loss(mu: jax.Array, logvar: jax.Array) -> jax.Array:
    """JAX/Pallas equivalent of KLLoss.forward(mu, logvar)."""
    assert mu.shape == logvar.shape
    shape = mu.shape
    if len(shape) < 2:
        raise ValueError("KLLoss expects rank >= 2 inputs (matches the torch module).")
    total = math.prod(shape)

    # Rank-dependent denominator, matching the PyTorch module exactly.
    if len(shape) in (3, 4):
        denom = float(total)                    # sum / numel
    else:
        denom = float(total) / float(shape[1])  # sum(dim=1).mean()

    # Lane-dense (R, 128) view in the NATIVE dtype (kernel upcasts on load).
    # TODO(synk): for minor dims that are not (8,128)-tile friendly XLA may lower
    # this flatten/pad as a relayout copy (one extra HBM pass per input);
    # blocking over the native minor dims in the kernel would avoid it.
    mu_flat = jnp.reshape(mu, (total,))
    lv_flat = jnp.reshape(logvar, (total,))

    rows = _cdiv(total, _LANES)
    padded = rows * _LANES
    if padded != total:
        # Ragged lane tail: zero-pad (mu=0, logvar=0 contributes exactly 0).
        mu_flat = jnp.pad(mu_flat, (0, padded - total))
        lv_flat = jnp.pad(lv_flat, (0, padded - total))

    mu_2d = mu_flat.reshape(rows, _LANES)
    lv_2d = lv_flat.reshape(rows, _LANES)

    # The -1/2 factor is hoisted out of the kernel and applied once here.
    return (-0.5) * _kl_sum(mu_2d, lv_2d) / denom


def _kl_loss_ref(mu, logvar):
    """Pure-JAX reference mirroring the PyTorch code path."""
    kl = -(1.0 + logvar - mu ** 2 - jnp.exp(logvar)) / 2.0
    if kl.ndim in (3, 4):
        return jnp.sum(kl) / kl.size
    return jnp.mean(jnp.sum(kl, axis=1))


if __name__ == "__main__":
    key = jax.random.PRNGKey(0)
    ks = jax.random.split(key, 10)

    # 4D case (NCHW-like latents): B=2, C=4, H=16, W=16  -> R=16 (fold-by-8 path)
    mu4 = jax.random.normal(ks[0], (2, 4, 16, 16), dtype=jnp.float32)
    lv4 = 0.1 * jax.random.normal(ks[1], (2, 4, 16, 16), dtype=jnp.float32)
    out4 = jax.block_until_ready(kl_loss(mu4, lv4))
    ref4 = _kl_loss_ref(mu4, lv4)
    assert jnp.allclose(out4, ref4, rtol=1e-5, atol=1e-5), (out4, ref4)

    # 3D case: B=2, C=8, D=32  -> R=4 (tiny single-block path)
    mu3 = jax.random.normal(ks[2], (2, 8, 32), dtype=jnp.float32)
    lv3 = 0.1 * jax.random.normal(ks[3], (2, 8, 32), dtype=jnp.float32)
    out3 = jax.block_until_ready(kl_loss(mu3, lv3))
    ref3 = _kl_loss_ref(mu3, lv3)
    assert jnp.allclose(out3, ref3, rtol=1e-5, atol=1e-5), (out3, ref3)

    # 2D case: B=2, D=32 (exercises the ragged lane-tail zero-pad, R=1)
    mu2 = jax.random.normal(ks[4], (2, 32), dtype=jnp.float32)
    lv2 = 0.1 * jax.random.normal(ks[5], (2, 32), dtype=jnp.float32)
    out2 = jax.block_until_ready(kl_loss(mu2, lv2))
    ref2 = _kl_loss_ref(mu2, lv2)
    assert jnp.allclose(out2, ref2, rtol=1e-5, atol=1e-5), (out2, ref2)

    # bf16 native-dtype path (no wrapper upcast; kernel upcasts on load).
    mub = mu4.astype(jnp.bfloat16)
    lvb = lv4.astype(jnp.bfloat16)
    outb = jax.block_until_ready(kl_loss(mub, lvb))
    refb = _kl_loss_ref(mub.astype(jnp.float32), lvb.astype(jnp.float32))
    assert jnp.allclose(outb, refb, rtol=1e-4, atol=1e-4), (outb, refb)

    # Multi-tile case with a partial tail tile: 4*16*100*100 = 640000 elems
    # -> 5000 rows -> 2 tiles of 4096 rows, second tile masked in-kernel.
    muL = jax.random.normal(ks[6], (4, 16, 100, 100), dtype=jnp.float32)
    lvL = 0.1 * jax.random.normal(ks[7], (4, 16, 100, 100), dtype=jnp.float32)
    outL = jax.block_until_ready(kl_loss(muL, lvL))
    refL = _kl_loss_ref(muL, lvL)
    assert jnp.allclose(outL, refL, rtol=1e-5, atol=1e-5), (outL, refL)

    print("KERNEL_OK")
</pallas_src>

<mosaic_0001>
module attributes {stable_mosaic.version = 11 : i64} {
  func.func @_kl_sum_kernel(%arg0: i32, %arg1: memref<16x128xf32, #tpu.memory_space<vmem>>, %arg2: memref<16x128xf32, #tpu.memory_space<vmem>>, %arg3: memref<64x128xf32, #tpu.memory_space<vmem>>) attributes {dimension_semantics = [#tpu.dimension_semantics<arbitrary>], iteration_bounds = array<i64: 1>, scalar_prefetch = 0 : i64, scratch_operands = 0 : i64, tpu.core_type = #tpu.core_type<tc>, window_params = [{transform_indices = @transform_0, window_bounds = array<i64: 16, 128>}, {transform_indices = @transform_1, window_bounds = array<i64: 16, 128>}, {pipeline_mode = #tpu.pipeline_mode<synchronous>, transform_indices = @transform_2, window_bounds = array<i64: 64, 128>}]} {
    %c0_i32 = arith.constant 0 : i32
    %0 = arith.cmpi eq, %arg0, %c0_i32 : i32
    %1 = arith.extui %0 : i1 to i32
    %c0_i32_0 = arith.constant 0 : i32
    %2 = arith.cmpi ne, %1, %c0_i32_0 : i32
    scf.if %2 {
      %cst_9 = arith.constant 0.000000e+00 : f32
      %16 = vector.broadcast %cst_9 : f32 to vector<64x128xf32>
      %c0_10 = arith.constant 0 : index
      %c0_11 = arith.constant 0 : index
      %17 = vector.load %arg3[%c0_10, %c0_11] : memref<64x128xf32, #tpu.memory_space<vmem>>, vector<64x128xf32>
      tpu.vector_store %arg3[%c0_10, %c0_11], %16 {strides = array<i32>} : memref<64x128xf32, #tpu.memory_space<vmem>>, vector<64x128xf32>,
    } else {
    }
    %c0 = arith.constant 0 : index
    %c0_1 = arith.constant 0 : index
    %3 = vector.load %arg1[%c0, %c0_1] : memref<16x128xf32, #tpu.memory_space<vmem>>, vector<16x128xf32>
    %c0_2 = arith.constant 0 : index
    %c0_3 = arith.constant 0 : index
    %4 = vector.load %arg2[%c0_2, %c0_3] : memref<16x128xf32, #tpu.memory_space<vmem>>, vector<16x128xf32>
    %cst = arith.constant 1.000000e+00 : f32
    %5 = vector.broadcast %cst : f32 to vector<16x128xf32>
    %6 = arith.addf %5, %4 : vector<16x128xf32>
    %7 = arith.mulf %3, %3 : vector<16x128xf32>
    %8 = arith.subf %6, %7 : vector<16x128xf32>
    %9 = math.exp %4 : vector<16x128xf32>
    %10 = arith.subf %8, %9 : vector<16x128xf32>
    %c0_4 = arith.constant 0 : index
    %c0_5 = arith.constant 0 : index
    %11 = vector.load %arg3[%c0_4, %c0_5] : memref<64x128xf32, #tpu.memory_space<vmem>>, vector<8x128xf32>
    %12 = vector.shape_cast %10 : vector<16x128xf32> to vector<2x8x128xf32>
    %cst_6 = arith.constant dense<0.000000e+00> : vector<8x128xf32>
    %13 = vector.multi_reduction <add>, %12, %cst_6 [0] : vector<2x8x128xf32> to vector<8x128xf32>
    %14 = arith.addf %11, %13 : vector<8x128xf32>
    %c0_7 = arith.constant 0 : index
    %c0_8 = arith.constant 0 : index
    %15 = vector.load %arg3[%c0_7, %c0_8] : memref<64x128xf32, #tpu.memory_space<vmem>>, vector<8x128xf32>
    tpu.vector_store %arg3[%c0_7, %c0_8], %14 {strides = array<i32>} : memref<64x128xf32, #tpu.memory_space<vmem>>, vector<8x128xf32>,
    return
  }
  func.func @transform_0(%arg0: i32) -> (i32, i32) {
    %c0_i32 = arith.constant 0 : i32
    %c0_i32_0 = arith.constant 0 : i32
    return %arg0, %c0_i32 : i32, i32
  }
  func.func @transform_1(%arg0: i32) -> (i32, i32) {
    %c0_i32 = arith.constant 0 : i32
    %c0_i32_0 = arith.constant 0 : i32
    return %arg0, %c0_i32 : i32, i32
  }
  func.func @transform_2(%arg0: i32) -> (i32, i32) {
    %c0_i32 = arith.constant 0 : i32
    %c0_i32_0 = arith.constant 0 : i32
    %c0_i32_1 = arith.constant 0 : i32
    return %c0_i32, %c0_i32_0 : i32, i32
  }
}

</mosaic_0001>

<bundles_post_ra>
// kernel: tpu_custom_call.1
= control target key start
LH: loop header
LB: loop body
LE: loop exit
PB: predicated region body
PF: predicated region fallthrough
CT: control target
= control target key end

     0   :  { %7 = vsyncpa [#allocation3], 0  ;;  %s238_s0 = inlined_call_operand.hbm [shape: f32[16,128], index: 0, kind: input, shape index: {}]   ;;  %s239_s1 = inlined_call_operand.hbm [shape: f32[16,128], index: 1, kind: input, shape index: {}]   ;;  %s240_s2 = inlined_call_operand.hbm [shape: f32[64,128], index: 2, kind: output, shape index: {}]  }
   0x1   :  { %8 = vsyncpa [#allocation6], 0 }
   0x2   :  { %9 = vsyncpa [#allocation4], 0  ;;  %s172_s9 = smov [#allocation2]   ;;  %s100_s13 = scalar_lea.hbm %s238_s0, 256 }
   0x3   :  { %s15_s10 = sshll.u32 %s172_s9, 4  ;;  %p101_p0 = scmp.ne.s32.totalorder %s238_s0, %s100_s13  ;;  %s16_s10 = int_to_ptr.vmem [resolvable:$true] %s15_s10 }
   0x4   :  { %p104_p1 = scmp.lt.u32.totalorder %s100_s13, %s238_s0 }
   0x6   :  { %p106_p2 = pnand %p104_p1, %p101_p0 }
   0x8   :  { %109 = shalt.err (!%p106_p2)
}
   0x9   :  { %s110_s18 = scalar_lea.vmem %s16_s10, 256  ;;  %p115_p4 = scmp.lt.s32.totalorder %s16_s10, %s16_s10 }
   0xa   :  { %p111_p3 = scmp.ne.s32.totalorder %s16_s10, %s110_s18  ;;  %p116_p5 = scmp.lt.s32.totalorder %s110_s18, %s110_s18 }
   0xc   :  { %p117_p6 = por %p116_p5, %p115_p4 }
   0xe   :  { %p118_p7 = pnand %p117_p6, %p111_p3 }
  0x10   :  { %121 = shalt.err (!%p118_p7)
}
  0x11   :  { %s173_s19 = smov 128   ;;  %s174_s20 = smov 8  }
  0x12   :  { %21 = dma.hbm_to_vmem [thread:$0]  %s238_s0, 256, %s16_s10, [#allocation3], %s173_s19, %s173_s19, %s174_s20  }
  0x13   :  { %s175_s23 = smov [#allocation5]   ;;  %s122_s27 = scalar_lea.hbm %s239_s1, 256 }
  0x14   :  { %s27_s24 = sshll.u32 %s175_s23, 4  ;;  %p123_p8 = scmp.ne.s32.totalorder %s239_s1, %s122_s27  ;;  %s28_s24 = int_to_ptr.vmem [resolvable:$true] %s27_s24 }
  0x15   :  { %p126_p9 = scmp.lt.u32.totalorder %s122_s27, %s239_s1 }
  0x17   :  { %p128_p10 = pnand %p126_p9, %p123_p8 }
  0x19   :  { %131 = shalt.err (!%p128_p10)
}
  0x1a   :  { %s132_s4 = scalar_lea.vmem %s28_s24, 256  ;;  %p137_p12 = scmp.lt.s32.totalorder %s28_s24, %s28_s24 }
  0x1b   :  { %p133_p11 = scmp.ne.s32.totalorder %s28_s24, %s132_s4  ;;  %p138_p13 = scmp.lt.s32.totalorder %s132_s4, %s132_s4 }
  0x1d   :  { %p139_p0 = por %p138_p13, %p137_p12 }
  0x1f   :  { %p140_p1 = pnand %p139_p0, %p133_p11 }
  0x21   :  { %143 = shalt.err (!%p140_p1)
}
  0x22   :  { %33 = dma.hbm_to_vmem [thread:$0]  %s239_s1, 256, %s28_s24, [#allocation6], %s173_s19, %s173_s19, %s174_s20  }
  0x23   :  { %166 = dma.done.wait [#allocation3], 256  }
  0x24   :  { %167 = vsyncadd [#allocation3], 4294967040 }
  0x25   :  { %168 = dma.done.wait [#allocation6], 256  }
  0x26   :  { %169 = vsyncadd [#allocation6], 4294967040  ;;  %v176_v0 = vmov 0.0   ;;  %v54_v1 = vld [vmem:[#allocation5] sm:$0xff]  ;;  %v55_v2 = vld [vmem:[#allocation5 + $0x8] sm:$0xff]  ;;  %s177_s1 = smov [#allocation7]  }
  0x27   :  { %45 = vst [vmem:[#allocation7 + $0x8] sm:$0xff] %v176_v0  ;;  %46 = vst [vmem:[#allocation7 + $0x10] sm:$0xff] %v176_v0  ;;  %v62_v3 = vmul.f32 1.442695, %v54_v1  ;;  %v64_v4 = vmul.f32 1.442695, %v55_v2 }
  0x28   :  { %47 = vst [vmem:[#allocation7 + $0x18] sm:$0xff] %v176_v0  ;;  %48 = vst [vmem:[#allocation7 + $0x20] sm:$0xff] %v176_v0  ;;  %v52_v5 = vld [vmem:[#allocation2] sm:$0xff]  ;;  %v53_v6 = vld [vmem:[#allocation2 + $0x8] sm:$0xff]  ;;  %v56_v7 = vadd.f32 1.0, %v54_v1  ;;  %v57_v9 = vadd.f32 1.0, %v55_v2 }
  0x29   :  { %49 = vst [vmem:[#allocation7 + $0x28] sm:$0xff] %v176_v0  ;;  %50 = vst [vmem:[#allocation7 + $0x30] sm:$0xff] %v176_v0  ;;  %96 = vpow2.f32 %v62_v3  ;;  %v58_v8 = vmul.f32 %v52_v5, %v52_v5  ;;  %v59_v10 = vmul.f32 %v53_v6, %v53_v6  ;;  %s77_s6 = sshll.u32 %s177_s1, 4  ;;  %s78_s6 = int_to_ptr.vmem [resolvable:$true] %s77_s6 }
  0x2a   :  { %51 = vst [vmem:[#allocation7 + $0x38] sm:$0xff] %v176_v0  ;;  %98 = vpow2.f32 %v64_v4  ;;  %s144_s7 = scalar_lea.vmem %s78_s6, 1024  ;;  %p149_p3 = scmp.lt.s32.totalorder %s78_s6, %s78_s6 }
  0x2b   :  { %v60_v11 = vsub.f32 %v56_v7, %v58_v8  ;;  %v61_v12 = vsub.f32 %v57_v9, %v59_v10  ;;  %p145_p2 = scmp.ne.s32.totalorder %s78_s6, %s144_s7  ;;  %p150_p4 = scmp.lt.s32.totalorder %s144_s7, %s144_s7 }
  0x2d   :  { %p151_p5 = por %p150_p4, %p149_p3 }
  0x2f   :  { %p152_p6 = pnand %p151_p5, %p145_p2 }
  0x33   :  { %v97_v13 = vpop.eup %96 }
  0x34   :  { %v99_v14 = vpop.eup %98  ;;  %v66_v15 = vsub.f32 %v60_v11, %v97_v13 }
  0x35   :  { %v67_v16 = vsub.f32 %v61_v12, %v99_v14 }
  0x37   :  { %v69_v17 = vadd.f32 %v67_v16, %v66_v15 }
  0x39   :  { %71 = vst [vmem:[#allocation7] sm:$0xff] %v69_v17 }
  0x3a   :  { %155 = shalt.err (!%p152_p6)
}
  0x3b   :  { %s156_s10 = scalar_lea.hbm %s240_s2, 1024 }
  0x3c   :  { %p157_p7 = scmp.ne.s32.totalorder %s240_s2, %s156_s10  ;;  %p160_p8 = scmp.lt.u32.totalorder %s156_s10, %s240_s2 }
  0x3e   :  { %p162_p9 = pnand %p160_p8, %p157_p7 }
  0x40   :  { %165 = shalt.err (!%p162_p9)
}
  0x41   :  { %83 = dma.vmem_to_hbm [thread:$0]  %s78_s6, 1024, %s240_s2, [#allocation4], %s173_s19, %s173_s19, %s174_s20  }
  0x42   :  { %170 = dma.done.wait [#allocation4], 1024  }
  0x43   :  { %171 = vsyncadd [#allocation4], 4294966272 }
  0x44   :  { %87 = vsyncpa [#allocation3], 1 }
  0x45   :  { %88 = vsyncpa [#allocation6], 1 }
  0x46   :  { %89 = vsyncpa [#allocation4], 1 }

</bundles_post_ra>
